<compile_context>
chip_gen: v6e
topology: v6e:2x2x1
jax: 0.10.0
libtpu: 0.0.40
codegen_flags: <defaults>
</compile_context>

<pallas_src>
import jax
import jax.numpy as jnp
from jax.experimental import pallas as pl
from jax.experimental.pallas import tpu as pltpu


def _leaky_relu(x, slope=0.2):
    return jnp.where(x > 0, x, slope * x)


def qnet_kernel(x_ref, w1_ref, b1_ref, w2_ref, b2_ref, w3_ref, b3_ref, o_ref):
    # One batch tile per grid step; everything here is VMEM-resident.
    x = x_ref[...].astype(jnp.bfloat16)                       # bf16 MXU input
    h1 = jnp.dot(x, w1_ref[...], preferred_element_type=jnp.float32)
    h1 = _leaky_relu(h1 + b1_ref[...])                        # f32 VPU math
    h2 = jnp.dot(h1.astype(jnp.bfloat16), w2_ref[...],
                 preferred_element_type=jnp.float32)
    h2 = _leaky_relu(h2 + b2_ref[...])
    out = jnp.dot(h2.astype(jnp.bfloat16), w3_ref[...],
                  preferred_element_type=jnp.float32) + b3_ref[...]
    o_ref[...] = out.astype(o_ref.dtype)


def _round_up(x, m):
    return ((x + m - 1) // m) * m


def qnet_forward(x, params, tm=256):
    """x: (B, state_size) f32. params: dict with w1,b1,w2,b2,w3,b3 (w as (in,out))."""
    # Pre-cast weights to bf16 (halves weight HBM bytes, ~3x MXU throughput);
    # keep biases in f32 for the f32 epilogue.
    w1 = params["w1"].astype(jnp.bfloat16)
    w2 = params["w2"].astype(jnp.bfloat16)
    w3 = params["w3"].astype(jnp.bfloat16)
    b1, b2, b3 = params["b1"], params["b2"], params["b3"]

    B, state_size = x.shape
    action_size = w3.shape[1]

    # Batch tile: multiple of 8 (sublane), target `tm` (>=256 fills MXU rows),
    # but never larger than the (padded) batch so tiny batches still work.
    tm_eff = min(_round_up(tm, 8), _round_up(B, 8))
    b_pad = _round_up(B, tm_eff)
    if b_pad != B:
        x = jnp.pad(x, ((0, b_pad - B), (0, 0)))
    n_blocks = pl.cdiv(b_pad, tm_eff)

    # Weights/biases: full-array blocks with a constant index_map -> fetched
    # once, VMEM-resident for the whole grid (no per-step weight DMA).
    resident = lambda shape: pl.BlockSpec(shape, lambda i: (0, 0))

    out = pl.pallas_call(
        qnet_kernel,
        out_shape=jax.ShapeDtypeStruct((b_pad, action_size), jnp.float32),
        grid=(n_blocks,),
        in_specs=[
            pl.BlockSpec((tm_eff, state_size), lambda i: (i, 0)),   # x: batch-tiled
            resident(w1.shape), resident(b1.shape),
            resident(w2.shape), resident(b2.shape),
            resident(w3.shape), resident(b3.shape),
        ],
        out_specs=pl.BlockSpec((tm_eff, action_size), lambda i: (i, 0)),
        compiler_params=pltpu.CompilerParams(
            dimension_semantics=("parallel",),   # v7x: shard batch over 2 TCs
        ),
    )(x, w1, b1, w2, b2, w3, b3)

    return out[:B]


def init_params(key, state_size, action_size):
    """Deterministic init mirroring PyTorch Linear shapes; weights stored (in, out)."""
    ks = jax.random.split(key, 6)

    def linear(kw, kb, fan_in, fan_out):
        bound = 1.0 / jnp.sqrt(jnp.float32(fan_in))
        w = jax.random.uniform(kw, (fan_in, fan_out), jnp.float32, -bound, bound)
        b = jax.random.uniform(kb, (1, fan_out), jnp.float32, -bound, bound)
        return w, b

    w1, b1 = linear(ks[0], ks[1], state_size, 256)
    w2, b2 = linear(ks[2], ks[3], 256, 128)
    w3, b3 = linear(ks[4], ks[5], 128, action_size)
    return {"w1": w1, "b1": b1, "w2": w2, "b2": b2, "w3": w3, "b3": b3}


def qnet_reference(x, p):
    h1 = _leaky_relu(x @ p["w1"] + p["b1"])
    h2 = _leaky_relu(h1 @ p["w2"] + p["b2"])
    return h2 @ p["w3"] + p["b3"]


if __name__ == "__main__":
    state_size = 16
    action_size = 4

    key = jax.random.PRNGKey(0)
    k_x, k_p, k_x2 = jax.random.split(key, 3)
    params = init_params(k_p, state_size, action_size)

    # Test 1: tiny batch (single grid step, tile clamped to 8 rows).
    batch = 8
    x = jax.random.normal(k_x, (batch, state_size), jnp.float32)
    out = jax.block_until_ready(qnet_forward(x, params))
    ref = qnet_reference(x, params)
    assert out.shape == (batch, action_size)
    # bf16 matmul inputs with f32 accumulation -> loosened tolerance vs f32 ref.
    assert jnp.allclose(out, ref, atol=3e-2, rtol=3e-2), "mismatch vs reference (small batch)"

    # Test 2: multi-block grid + batch padding path (B=300 not a tile multiple).
    batch2 = 300
    x2 = jax.random.normal(k_x2, (batch2, state_size), jnp.float32)
    out2 = jax.block_until_ready(qnet_forward(x2, params, tm=128))
    ref2 = qnet_reference(x2, params)
    assert out2.shape == (batch2, action_size)
    assert jnp.allclose(out2, ref2, atol=3e-2, rtol=3e-2), "mismatch vs reference (tiled batch)"

    print("KERNEL_OK")
</pallas_src>

<mosaic_0001>
module attributes {stable_mosaic.version = 11 : i64} {
  func.func @qnet_kernel(%arg0: i32, %arg1: memref<8x16xf32, #tpu.memory_space<vmem>>, %arg2: memref<16x256xbf16, #tpu.memory_space<vmem>>, %arg3: memref<1x256xf32, #tpu.memory_space<vmem>>, %arg4: memref<256x128xbf16, #tpu.memory_space<vmem>>, %arg5: memref<1x128xf32, #tpu.memory_space<vmem>>, %arg6: memref<128x4xbf16, #tpu.memory_space<vmem>>, %arg7: memref<1x4xf32, #tpu.memory_space<vmem>>, %arg8: memref<8x4xf32, #tpu.memory_space<vmem>>) attributes {dimension_semantics = [#tpu.dimension_semantics<parallel>], iteration_bounds = array<i64: 1>, scalar_prefetch = 0 : i64, scratch_operands = 0 : i64, tpu.core_type = #tpu.core_type<tc>, window_params = [{transform_indices = @transform_0, window_bounds = array<i64: 8, 16>}, {pipeline_mode = #tpu.pipeline_mode<synchronous>, transform_indices = @transform_1, window_bounds = array<i64: 16, 256>}, {pipeline_mode = #tpu.pipeline_mode<synchronous>, transform_indices = @transform_2, window_bounds = array<i64: 1, 256>}, {pipeline_mode = #tpu.pipeline_mode<synchronous>, transform_indices = @transform_3, window_bounds = array<i64: 256, 128>}, {pipeline_mode = #tpu.pipeline_mode<synchronous>, transform_indices = @transform_4, window_bounds = array<i64: 1, 128>}, {pipeline_mode = #tpu.pipeline_mode<synchronous>, transform_indices = @transform_5, window_bounds = array<i64: 128, 4>}, {pipeline_mode = #tpu.pipeline_mode<synchronous>, transform_indices = @transform_6, window_bounds = array<i64: 1, 4>}, {transform_indices = @transform_7, window_bounds = array<i64: 8, 4>}]} {
    %c0 = arith.constant 0 : index
    %c0_0 = arith.constant 0 : index
    %0 = vector.load %arg1[%c0, %c0_0] : memref<8x16xf32, #tpu.memory_space<vmem>>, vector<8x16xf32>
    %1 = arith.truncf %0 : vector<8x16xf32> to vector<8x16xbf16>
    %c0_1 = arith.constant 0 : index
    %c0_2 = arith.constant 0 : index
    %2 = vector.load %arg2[%c0_1, %c0_2] : memref<16x256xbf16, #tpu.memory_space<vmem>>, vector<16x256xbf16>
    %cst = arith.constant dense<0.000000e+00> : vector<8x256xf32>
    %3 = tpu.matmul %1, %2, %cst {dimension_numbers = #tpu.dot_dimension_numbers<[1], [0], [0], [1], [0, 0, 1, 1], [], []>} : vector<8x16xbf16>, vector<16x256xbf16>, vector<8x256xf32> -> vector<8x256xf32>
    %c0_3 = arith.constant 0 : index
    %c0_4 = arith.constant 0 : index
    %4 = vector.load %arg3[%c0_3, %c0_4] : memref<1x256xf32, #tpu.memory_space<vmem>>, vector<1x256xf32>
    %5 = vector.broadcast %4 : vector<1x256xf32> to vector<8x256xf32>
    %6 = arith.addf %3, %5 : vector<8x256xf32>
    %cst_5 = arith.constant 0.000000e+00 : f32
    %7 = vector.broadcast %cst_5 : f32 to vector<8x256xf32>
    %8 = arith.cmpf ogt, %6, %7 : vector<8x256xf32>
    %cst_6 = arith.constant 2.000000e-01 : f32
    %9 = vector.broadcast %cst_6 : f32 to vector<8x256xf32>
    %10 = arith.mulf %9, %6 : vector<8x256xf32>
    %11 = arith.select %8, %6, %10 : vector<8x256xi1>, vector<8x256xf32>
    %12 = arith.truncf %11 : vector<8x256xf32> to vector<8x256xbf16>
    %c0_7 = arith.constant 0 : index
    %c0_8 = arith.constant 0 : index
    %13 = vector.load %arg4[%c0_7, %c0_8] : memref<256x128xbf16, #tpu.memory_space<vmem>>, vector<256x128xbf16>
    %cst_9 = arith.constant dense<0.000000e+00> : vector<8x128xf32>
    %14 = tpu.matmul %12, %13, %cst_9 {dimension_numbers = #tpu.dot_dimension_numbers<[1], [0], [0], [1], [0, 0, 1, 1], [], []>} : vector<8x256xbf16>, vector<256x128xbf16>, vector<8x128xf32> -> vector<8x128xf32>
    %c0_10 = arith.constant 0 : index
    %c0_11 = arith.constant 0 : index
    %15 = vector.load %arg5[%c0_10, %c0_11] : memref<1x128xf32, #tpu.memory_space<vmem>>, vector<1x128xf32>
    %16 = vector.broadcast %15 : vector<1x128xf32> to vector<8x128xf32>
    %17 = arith.addf %14, %16 : vector<8x128xf32>
    %cst_12 = arith.constant 0.000000e+00 : f32
    %18 = vector.broadcast %cst_12 : f32 to vector<8x128xf32>
    %19 = arith.cmpf ogt, %17, %18 : vector<8x128xf32>
    %cst_13 = arith.constant 2.000000e-01 : f32
    %20 = vector.broadcast %cst_13 : f32 to vector<8x128xf32>
    %21 = arith.mulf %20, %17 : vector<8x128xf32>
    %22 = arith.select %19, %17, %21 : vector<8x128xi1>, vector<8x128xf32>
    %23 = arith.truncf %22 : vector<8x128xf32> to vector<8x128xbf16>
    %c0_14 = arith.constant 0 : index
    %c0_15 = arith.constant 0 : index
    %24 = vector.load %arg6[%c0_14, %c0_15] : memref<128x4xbf16, #tpu.memory_space<vmem>>, vector<128x4xbf16>
    %cst_16 = arith.constant dense<0.000000e+00> : vector<8x4xf32>
    %25 = tpu.matmul %23, %24, %cst_16 {dimension_numbers = #tpu.dot_dimension_numbers<[1], [0], [0], [1], [0, 0, 1, 1], [], []>} : vector<8x128xbf16>, vector<128x4xbf16>, vector<8x4xf32> -> vector<8x4xf32>
    %c0_17 = arith.constant 0 : index
    %c0_18 = arith.constant 0 : index
    %26 = vector.load %arg7[%c0_17, %c0_18] : memref<1x4xf32, #tpu.memory_space<vmem>>, vector<1x4xf32>
    %27 = vector.broadcast %26 : vector<1x4xf32> to vector<8x4xf32>
    %28 = arith.addf %25, %27 : vector<8x4xf32>
    %c0_19 = arith.constant 0 : index
    %c0_20 = arith.constant 0 : index
    %29 = vector.load %arg8[%c0_19, %c0_20] : memref<8x4xf32, #tpu.memory_space<vmem>>, vector<8x4xf32>
    tpu.vector_store %arg8[%c0_19, %c0_20], %28 {strides = array<i32>} : memref<8x4xf32, #tpu.memory_space<vmem>>, vector<8x4xf32>,
    return
  }
  func.func @transform_0(%arg0: i32) -> (i32, i32) {
    %c0_i32 = arith.constant 0 : i32
    %c0_i32_0 = arith.constant 0 : i32
    return %arg0, %c0_i32 : i32, i32
  }
  func.func @transform_1(%arg0: i32) -> (i32, i32) {
    %c0_i32 = arith.constant 0 : i32
    %c0_i32_0 = arith.constant 0 : i32
    %c0_i32_1 = arith.constant 0 : i32
    return %c0_i32, %c0_i32_0 : i32, i32
  }
  func.func @transform_2(%arg0: i32) -> (i32, i32) {
    %c0_i32 = arith.constant 0 : i32
    %c0_i32_0 = arith.constant 0 : i32
    %c0_i32_1 = arith.constant 0 : i32
    return %c0_i32, %c0_i32_0 : i32, i32
  }
  func.func @transform_3(%arg0: i32) -> (i32, i32) {
    %c0_i32 = arith.constant 0 : i32
    %c0_i32_0 = arith.constant 0 : i32
    %c0_i32_1 = arith.constant 0 : i32
    return %c0_i32, %c0_i32_0 : i32, i32
  }
  func.func @transform_4(%arg0: i32) -> (i32, i32) {
    %c0_i32 = arith.constant 0 : i32
    %c0_i32_0 = arith.constant 0 : i32
    %c0_i32_1 = arith.constant 0 : i32
    return %c0_i32, %c0_i32_0 : i32, i32
  }
  func.func @transform_5(%arg0: i32) -> (i32, i32) {
    %c0_i32 = arith.constant 0 : i32
    %c0_i32_0 = arith.constant 0 : i32
    %c0_i32_1 = arith.constant 0 : i32
    return %c0_i32, %c0_i32_0 : i32, i32
  }
  func.func @transform_6(%arg0: i32) -> (i32, i32) {
    %c0_i32 = arith.constant 0 : i32
    %c0_i32_0 = arith.constant 0 : i32
    %c0_i32_1 = arith.constant 0 : i32
    return %c0_i32, %c0_i32_0 : i32, i32
  }
  func.func @transform_7(%arg0: i32) -> (i32, i32) {
    %c0_i32 = arith.constant 0 : i32
    %c0_i32_0 = arith.constant 0 : i32
    return %arg0, %c0_i32 : i32, i32
  }
}

</mosaic_0001>

<bundles_post_ra>
// kernel: tpu_custom_call.1
= control target key start
LH: loop header
LB: loop body
LE: loop exit
PB: predicated region body
PF: predicated region fallthrough
CT: control target
= control target key end

     0   :  { %12 = vsyncpa [#allocation3], 0  ;;  %s552_s24 = smov [#allocation2]   ;;  %s646_s0 = inlined_call_operand.vmem [shape: f32[8,16], index: 0, kind: input, shape index: {}]   ;;  %s647_s1 = inlined_call_operand.vmem [shape: bf16[16,256], index: 1, kind: input, shape index: {}]   ;;  %s648_s2 = inlined_call_operand.vmem [shape: f32[1,256], index: 2, kind: input, shape index: {}]   ;;  %s649_s3 = inlined_call_operand.hbm [shape: bf16[256,128], index: 3, kind: input, shape index: {}]   ;;  %s650_s4 = inlined_call_operand.vmem [shape: f32[1,128], index: 4, kind: input, shape index: {}]   ;;  %s651_s5 = inlined_call_operand.vmem [shape: bf16[128,4], index: 5, kind: input, shape index: {}]   ;;  %s652_s6 = inlined_call_operand.vmem [shape: f32[1,4], index: 6, kind: input, shape index: {}]   ;;  %s653_s7 = inlined_call_operand.vmem [shape: f32[8,4], index: 7, kind: output, shape index: {}]  }
   0x1   :  { %s24_s25 = sshll.u32 %s552_s24, 4  ;;  %s25_s25 = int_to_ptr.vmem [resolvable:$true] %s24_s25 }
   0x2   :  { %s538_s26 = scalar_lea.vmem %s25_s25, 2048  ;;  %p543_p1 = scmp.lt.s32.totalorder %s25_s25, %s25_s25 }
   0x3   :  { %p539_p0 = scmp.ne.s32.totalorder %s25_s25, %s538_s26  ;;  %p544_p2 = scmp.lt.s32.totalorder %s538_s26, %s538_s26 }
   0x5   :  { %p545_p3 = por %p544_p2, %p543_p1 }
   0x7   :  { %p546_p4 = pnand %p545_p3, %p539_p0 }
   0x9   :  { %549 = shalt.err (!%p546_p4)
}
   0xa   :  { %s553_s27 = smov 64   ;;  %s554_s28 = smov 4  }
   0xb   :  { %30 = dma.hbm_to_vmem [thread:$0]  %s649_s3, 2048, %s25_s25, [#allocation3], %s553_s27, %s553_s27, %s554_s28  }
   0xc   :  { %550 = dma.done.wait [#allocation3], 2048  }
   0xd   :  { %551 = vsyncadd [#allocation3], 4294965248  ;;  %v555_v0 = vmov 0   ;;  %v503_v1 = vld [vmem:[%s647_s1 + $0x4] ss:$8 sps:$4 sm:$0xff]   ;;  %v506_v5 = vld [vmem:[#allocation2 + $0x78] sm:$0xff]   ;;  %v47_v27 = vlaneseq }
   0xe   :  { %103 = vmatprep.mubr.bf16.mxu0 %v555_v0  ;;  %v505_v2 = vld [vmem:[%s647_s1] ss:$8 sps:$4 sm:$0xff]   ;;  %85 = vmatprep.subr.bf16.mxu0 %v503_v1  ;;  %vm67_vm0 = vcmask 130048   ;;  %v507_v6 = vld [vmem:[#allocation2 + $0x38] sm:$0xff]   ;;  %v508_v7 = vld [vmem:[#allocation2 + $0x70] sm:$0xff]   ;;  %v556_v22 = vmov 0.0  }
   0xf   :  { %v41_v3 = vld [vmem:[%s646_s0] sm:$0xff]  ;;  %86 = vmatpush1.bf16.msra.mxu0 %v505_v2  ;;  %446 = vmatprep.subr.bf16.mxu1 %v506_v5  ;;  %v509_v8 = vld [vmem:[#allocation2 + $0x30] sm:$0xff]   ;;  %v510_v9 = vld [vmem:[#allocation2 + $0x68] sm:$0xff]   ;;  %v48_v28 = vshrl.u32 %v47_v27, 7  ;;  %vm557_vm3 = vmmov 0   ;;  %vm410_vm5 = vcmask 31744  }
  0x10   :  { %v42_v4 = vpack.c.bf16 %v41_v3, %v41_v3  ;;  %447 = vmatpush3.bf16.msra.mxu1 %v507_v6  ;;  %v511_v10 = vld [vmem:[#allocation2 + $0x28] sm:$0xff]   ;;  %v512_v11 = vld [vmem:[#allocation2 + $0x60] sm:$0xff]   ;;  %v514_v13 = vld [vmem:[#allocation2 + $0x58] sm:$0xff]   ;;  %477 = vmatprep.subr.bf16.mxu0 %v556_v22 }
  0x11   :  { %448 = vmatprep.subr.bf16.mxu1 %v508_v7  ;;  %v513_v12 = vld [vmem:[#allocation2 + $0x20] sm:$0xff]   ;;  %v515_v14 = vld [vmem:[#allocation2 + $0x18] sm:$0xff]   ;;  %v516_v15 = vld [vmem:[#allocation2 + $0x50] sm:$0xff]   ;;  %v49_v29 = vsub.s32 0, %v48_v28  ;;  %v53_v31 = vsub.s32 1, %v48_v28 }
  0x12   :  { %419 = vmatmul.mubr.msk.bf16.vlgmr.msra.gmra.mxu0 %vm67_vm0, %v42_v4  ;;  %v517_v16 = vld [vmem:[#allocation2 + $0x10] sm:$0xff]   ;;  %v518_v17 = vld [vmem:[#allocation2 + $0x48] sm:$0xff]   ;;  %v520_v19 = vld [vmem:[#allocation2 + $0x40] sm:$0xff]  }
  0x13   :  { %v519_v18 = vld [vmem:[#allocation2 + $0x8] sm:$0xff]   ;;  %v521_v20 = vld [vmem:[#allocation2] sm:$0xff]   ;;  %v522_v21 = vld [vmem:[%s651_s5 + $0x38] sm:$0xff]   ;;  %493 = vmatprep.mubr.msk.bf16.mxu0 %vm557_vm3, %v556_v22 }
  0x14   :  { %449 = vmatpush3.bf16.msra.mxu1 %v509_v8  ;;  %478 = vmatpush3.bf16.msra.mxu0 %v522_v21  ;;  %v523_v23 = vld [vmem:[%s651_s5 + $0x30] sm:$0xff]   ;;  %v524_v24 = vld [vmem:[%s651_s5 + $0x28] sm:$0xff]   ;;  %v525_v25 = vld [vmem:[%s651_s5 + $0x20] sm:$0xff]  }
  0x15   :  { %450 = vmatprep.subr.bf16.mxu1 %v510_v9  ;;  %479 = vmatprep.subr.bf16.mxu0 %v556_v22  ;;  %v526_v26 = vld [vmem:[%s651_s5 + $0x18] sm:$0xff]   ;;  %v45_v30 = vld [vmem:[%s648_s2] sm:$0x3]  ;;  %v527_v46 = vld [vmem:[%s651_s5 + $0x10] sm:$0xff]  }
  0x16   :  { %v50_v32 = vrot.slane %v45_v30, %v49_v29  ;;  %v54_v33 = vrot.slane %v45_v30, %v53_v31  ;;  %v528_v47 = vld [vmem:[%s651_s5 + $0x8] sm:$0xff]   ;;  %v529_v48 = vld [vmem:[%s651_s5] sm:$0xff]  }
  0x17   :  { %v420_v50 = vld [vmem:[%s650_s4] ss:$0 sm:$0xff] }
  0x18   :  { %451 = vmatpush3.bf16.msra.mxu1 %v511_v10  ;;  %480 = vmatpush3.bf16.msra.mxu0 %v523_v23  ;;  %v437_v59 = vld [vmem:[%s652_s6] ss:$0 sm:$0xff] }
  0x19   :  { %452 = vmatprep.subr.bf16.mxu1 %v512_v11  ;;  %481 = vmatprep.subr.bf16.mxu0 %v556_v22 }
  0x1c   :  { %453 = vmatpush3.bf16.msra.mxu1 %v513_v12  ;;  %482 = vmatpush3.bf16.msra.mxu0 %v524_v24 }
  0x1d   :  { %454 = vmatprep.subr.bf16.mxu1 %v514_v13  ;;  %483 = vmatprep.subr.bf16.mxu0 %v556_v22 }
  0x20   :  { %455 = vmatpush3.bf16.msra.mxu1 %v515_v14  ;;  %484 = vmatpush3.bf16.msra.mxu0 %v525_v25 }
  0x21   :  { %456 = vmatprep.subr.bf16.mxu1 %v516_v15  ;;  %485 = vmatprep.subr.bf16.mxu0 %v556_v22 }
  0x24   :  { %457 = vmatpush3.bf16.msra.mxu1 %v517_v16  ;;  %486 = vmatpush3.bf16.msra.mxu0 %v526_v26 }
  0x25   :  { %458 = vmatprep.subr.bf16.mxu1 %v518_v17  ;;  %487 = vmatprep.subr.bf16.mxu0 %v556_v22 }
  0x28   :  { %459 = vmatpush3.bf16.msra.mxu1 %v519_v18  ;;  %488 = vmatpush3.bf16.msra.mxu0 %v527_v46 }
  0x29   :  { %460 = vmatprep.subr.bf16.mxu1 %v520_v19  ;;  %489 = vmatprep.subr.bf16.mxu0 %v556_v22 }
  0x2c   :  { %461 = vmatpush3.bf16.msra.mxu1 %v521_v20  ;;  %490 = vmatpush3.bf16.msra.mxu0 %v528_v47 }
  0x2d   :  { %491 = vmatprep.subr.bf16.mxu0 %v556_v22 }
  0x30   :  { %492 = vmatpush3.bf16.msra.mxu0 %v529_v48 }
  0xd2   :  { %v105_v34 = vpop.f32.mrf.mxu0 }
  0xd3   :  { %v106_v35 = vadd.f32 %v105_v34, %v50_v32 }
  0xd4   :  { %v107_v36 = vpop.f32.mrf.mxu0 }
  0xd5   :  { %vm112_vm1 = vcmp.gt.f32.partialorder %v106_v35, 0.0  ;;  %v114_v37 = vmul.f32 0.2, %v106_v35  ;;  %v108_v38 = vadd.f32 %v107_v36, %v54_v33 }
  0xd6   :  { %v109_v39 = vpop.f32.mrf.mxu0 }
  0xd7   :  { %vm113_vm2 = vcmp.gt.f32.partialorder %v108_v38, 0.0  ;;  %v115_v40 = vmul.f32 0.2, %v108_v38  ;;  %v116_v42 = vsel %vm112_vm1, %v106_v35, %v114_v37 }
  0xd8   :  { %v110_v41 = vpop.f32.mrf.mxu0  ;;  %v118_v45 = vpack.c.bf16 %v116_v42, %v116_v42 }
  0xd9   :  { %v117_v43 = vsel %vm113_vm2, %v108_v38, %v115_v40 }
  0xda   :  { %v119_v44 = vpack.c.bf16 %v117_v43, %v117_v43 }
  0xdc   :  { %287 = vmatprep.mubr.bf16.mxu1 %v119_v44 }
  0xdd   :  { %288 = vmatmul.mubr.bf16.vlgmr.msra.gmra.mxu1 %v118_v45 }
 0x19d   :  { %v462_v49 = vpop.f32.mrf.mxu1 }
 0x19f   :  { %v463_v51 = vpop.f32.mrf.mxu1 }
 0x1a0   :  { %v464_v52 = vadd.f32 %v463_v51, %v462_v49 }
 0x1a1   :  { %v465_v53 = vpop.f32.mrf.mxu1 }
 0x1a2   :  { %v290_v54 = vadd.f32 %v464_v52, %v420_v50 }
 0x1a3   :  { %v466_v55 = vpop.f32.mrf.mxu1 }
 0x1a4   :  { %vm295_vm4 = vcmp.gt.f32.partialorder %v290_v54, 0.0  ;;  %v296_v56 = vmul.f32 0.2, %v290_v54 }
 0x1a6   :  { %v297_v57 = vsel %vm295_vm4, %v290_v54, %v296_v56 }
 0x1a7   :  { %v298_v58 = vpack.c.bf16 %v297_v57, %v297_v57 }
 0x1a9   :  { %494 = vmatmul.mubr.bf16.vlgmr.msra.gmra.mxu0 %v298_v58 }
 0x269   :  { %v404_v60 = vpop.f32.mrf.mxu0 }
 0x26a   :  { %v405_v61 = vadd.f32 %v437_v59, %v404_v60 }
 0x26b   :  { %v495_v62 = vpop.f32.mrf.mxu0 }
 0x26c   :  { %411 = vst.msk [vmem:[%s653_s7] sm:$0xff] %vm410_vm5, %v405_v61 }
 0x26d   :  { %v407_v63 = vpop.f32.mrf.mxu0 }
 0x26f   :  { %v496_v0 = vpop.f32.mrf.mxu0 }
 0x270   :  { %416 = vsyncpa [#allocation3], 1 }

</bundles_post_ra>
